<compile_context>
chip_gen: v7x
topology: tpu7x:2x2x1
jax: 0.10.0
libtpu: 0.0.40
codegen_flags: <defaults>
</compile_context>

<pallas_src>
import functools

import jax
import jax.numpy as jnp
from jax.experimental import pallas as pl
from jax.experimental.pallas import tpu as pltpu


def _round_up(x, m):
    return ((x + m - 1) // m) * m


def _cdiv(a, b):
    return (a + b - 1) // b


def _vmem_capacity_bytes():
    try:
        return int(pltpu.get_tpu_info().vmem_capacity_bytes)
    except Exception:
        # Unknown -> assume the smallest (v7x: 64 MiB per TensorCore).
        return 64 << 20


_VMEM_CAPACITY = _vmem_capacity_bytes()

if _VMEM_CAPACITY >= (96 << 20):
    # v5e / v6e: 128 MiB VMEM -> 16 MiB f32 output blocks, 64 MiB scoped cap.
    _TM_PREF, _TN_PREF, _VMEM_CAP = 1024, 4096, 64 << 20
else:
    # v7x: 64 MiB VMEM per TC -> 8 MiB output blocks, leave compiler headroom.
    _TM_PREF, _TN_PREF, _VMEM_CAP = 1024, 2048, 48 << 20


def _pick_tile(n, pref, align):
    """Tile size for an axis of extent n (alignment `align`).

    Returns the whole aligned extent when it is <= pref (single block);
    otherwise the largest multiple of `align` in [pref/2, pref] that divides
    the aligned extent exactly (no padding); otherwise `pref` and the caller
    pads the *input* up to a tile multiple (output stores are masked).
    """
    n_al = _round_up(n, align)
    if n_al <= pref:
        return n_al
    t = (pref // align) * align
    floor = max(align, (pref // 2 // align) * align)
    while t >= floor:
        if n_al % t == 0:
            return t
        t -= align
    return (pref // align) * align


def _mm_kernel(a_ref, b_ref, o_ref):
    # a: (tm, D), b: (D, tn) -> o: (tm, tn).  The latent dim D is tiny and kept
    # fully resident, so there is no reduction grid axis.  Accumulate in f32 on
    # the MXU; cast only on the final store (bf16 output mode).  Default matmul
    # precision is used (matched the f32 reference to <1e-4 in testing; the
    # kernel is write-bound so HIGHEST would also be free if bit-closeness to
    # torch mattered).
    o_ref[...] = jnp.dot(
        a_ref[...], b_ref[...], preferred_element_type=jnp.float32
    ).astype(o_ref.dtype)


@functools.partial(jax.jit, static_argnames=("out_dtype",))
def _matmul_abt(a, b, out_dtype=jnp.float32):
    """a: [M, D], b: [N, D] -> a @ b^T : [M, N] via Pallas."""
    M, D = a.shape
    N, _ = b.shape
    out_dtype = jnp.dtype(out_dtype)

    # Output-block alignment depends on the output dtype: (8,128) for f32,
    # (16,128) for bf16 (sublane packing).
    m_align = max(8, 32 // out_dtype.itemsize)
    n_align = 128

    tm = _pick_tile(M, _TM_PREF, m_align)
    tn = _pick_tile(N, _TN_PREF, n_align)

    M_al = _round_up(M, m_align)
    N_al = _round_up(N, n_align)

    # v7x has two TensorCores per chip: make sure a "parallel" grid axis has at
    # least two blocks so both get work.  On single-TC chips the one extra grid
    # step (~0.35us) is noise.
    if _cdiv(M_al, tm) * _cdiv(N_al, tn) == 1 and M_al > m_align:
        tm = _round_up(_cdiv(M_al, 2), m_align)

    grid_m = _cdiv(M, tm)
    grid_n = _cdiv(N, tn)
    M_pad = grid_m * tm
    N_pad = grid_n * tn

    # Pre-transpose b once (N*D elements, negligible next to the M*N output) so
    # its VMEM tile is lane-dense (D, tn) and the kernel has no RHS transpose.
    bt = b.T  # [D, N]
    # Pad the *inputs* (cheap) so every input block read is fully defined; the
    # output stays unpadded and its boundary blocks are masked on store.
    if M_pad != M:
        a = jnp.pad(a, ((0, M_pad - M), (0, 0)))
    if N_pad != N:
        bt = jnp.pad(bt, ((0, 0), (0, N_pad - N)))

    # VMEM budget from the actual (double-buffered, layout-padded) footprint.
    a_bytes = tm * _round_up(D, 128) * 4
    b_bytes = _round_up(D, 8) * tn * 4
    o_bytes = tm * tn * out_dtype.itemsize
    vmem_limit = int(
        min(max(2 * (a_bytes + b_bytes + o_bytes) + (4 << 20), 32 << 20), _VMEM_CAP)
    )

    # Grid order: j (N blocks) outer, i (M blocks) inner/fastest.  B's block
    # index depends only on j, so Q is DMA'd from HBM once per column stripe;
    # A is re-read grid_n times, costing ~D/tn (<2%) of the output traffic.
    out = pl.pallas_call(
        _mm_kernel,
        out_shape=jax.ShapeDtypeStruct((M, N), out_dtype),
        grid=(grid_n, grid_m),
        in_specs=[
            pl.BlockSpec((tm, D), lambda j, i: (i, 0)),
            pl.BlockSpec((D, tn), lambda j, i: (0, j)),
        ],
        out_specs=pl.BlockSpec((tm, tn), lambda j, i: (i, j)),
        compiler_params=pltpu.CompilerParams(
            dimension_semantics=("parallel", "parallel"),
            vmem_limit_bytes=vmem_limit,
        ),
    )(a, bt)
    return out


class WeightedMFPallas:
    """JAX/Pallas port of the PyTorch WeightedMF module's forward pass."""

    def __init__(self, n_users, n_items, dim, key, out_dtype=jnp.float32):
        self.n_users = n_users
        self.n_items = n_items
        self.dim = dim
        # out_dtype=jnp.bfloat16 halves HBM writeback (the kernel is write
        # bound) at the cost of bf16 output precision; default f32 matches the
        # PyTorch module's numerics.
        self.out_dtype = out_dtype
        kq, kp = jax.random.split(key)
        # torch.zeros(...).normal_(mean=0, std=0.1); kept in f32.
        self.Q = 0.1 * jax.random.normal(kq, (n_items, dim), dtype=jnp.float32)
        self.P = 0.1 * jax.random.normal(kp, (n_users, dim), dtype=jnp.float32)

    def forward(self, user_id=None, item_id=None):
        if user_id is None and item_id is None:
            return _matmul_abt(self.P, self.Q, out_dtype=self.out_dtype)
        if user_id is not None:
            # P[[user_id]] @ Q^T -> [len(user_id), n_items] (lane-dense: n_items)
            uid = jnp.atleast_1d(jnp.asarray(user_id, dtype=jnp.int32))
            p_rows = jnp.take(self.P, uid, axis=0)  # glue: row gather
            return _matmul_abt(p_rows, self.Q, out_dtype=self.out_dtype)
        # P @ Q[[item_id]]^T -> [n_users, len(item_id)]
        iid = jnp.atleast_1d(jnp.asarray(item_id, dtype=jnp.int32))
        q_rows = jnp.take(self.Q, iid, axis=0)  # glue: row gather
        if iid.shape[0] >= 128:
            # Output last dim already lane-dense; use the kernel directly.
            return _matmul_abt(self.P, q_rows, out_dtype=self.out_dtype)
        # Small item lists: compute Q[iid] @ P^T (lane-dense n_users output)
        # and transpose the small [n_users, len(iid)] result in plain JAX,
        # instead of emitting a lane-width-<128 masked-store kernel output.
        return _matmul_abt(q_rows, self.P, out_dtype=self.out_dtype).T


if __name__ == "__main__":
    key = jax.random.PRNGKey(0)
    n_users, n_items, dim = 128, 256, 32  # small shapes consistent with the module

    model = WeightedMFPallas(n_users, n_items, dim, key)

    # Full forward: P @ Q^T
    out_full = jax.block_until_ready(model.forward())
    ref_full = model.P @ model.Q.T
    assert out_full.shape == (n_users, n_items)
    assert jnp.allclose(out_full, ref_full, atol=1e-4, rtol=1e-4)

    # Single-user forward: P[[u]] @ Q^T (masked boundary rows on the output)
    out_user = jax.block_until_ready(model.forward(user_id=7))
    ref_user = model.P[7:8] @ model.Q.T
    assert out_user.shape == (1, n_items)
    assert jnp.allclose(out_user, ref_user, atol=1e-4, rtol=1e-4)

    # Single-item forward: P @ Q[[i]]^T (lane-dense kernel + wrapper transpose)
    out_item = jax.block_until_ready(model.forward(item_id=3))
    ref_item = model.P @ model.Q[3:4].T
    assert out_item.shape == (n_users, 1)
    assert jnp.allclose(out_item, ref_item, atol=1e-4, rtol=1e-4)

    # Large item list exercises the direct (no wrapper-transpose) item path.
    big_items = jnp.arange(n_items, dtype=jnp.int32)
    out_items = jax.block_until_ready(model.forward(item_id=big_items))
    assert out_items.shape == (n_users, n_items)
    assert jnp.allclose(out_items, ref_full, atol=1e-4, rtol=1e-4)

    # Ragged shapes exercise masked boundary blocks (no pad+slice extra pass).
    model2 = WeightedMFPallas(100, 200, dim, jax.random.PRNGKey(1))
    out2 = jax.block_until_ready(model2.forward())
    ref2 = model2.P @ model2.Q.T
    assert out2.shape == (100, 200)
    assert jnp.allclose(out2, ref2, atol=1e-4, rtol=1e-4)

    # Opt-in bf16 output mode (f32 accumulate, bf16 store; looser tolerance).
    out_bf16 = jax.block_until_ready(
        _matmul_abt(model.P, model.Q, out_dtype=jnp.bfloat16)
    )
    assert out_bf16.dtype == jnp.bfloat16
    assert jnp.allclose(out_bf16.astype(jnp.float32), ref_full, atol=3e-2, rtol=3e-2)

    print("KERNEL_OK")
</pallas_src>

<mosaic_0001>
module attributes {stable_mosaic.version = 11 : i64} {
  func.func @_mm_kernel(%arg0: i32, %arg1: i32, %arg2: memref<64x32xf32, #tpu.memory_space<vmem>>, %arg3: memref<32x256xf32, #tpu.memory_space<vmem>>, %arg4: memref<64x256xf32, #tpu.memory_space<vmem>>) attributes {dimension_semantics = [#tpu.dimension_semantics<parallel>, #tpu.dimension_semantics<parallel>], iteration_bounds = array<i64: 1, 2>, scalar_prefetch = 0 : i64, scratch_operands = 0 : i64, tpu.core_type = #tpu.core_type<tc>, window_params = [{transform_indices = @transform_0, window_bounds = array<i64: 64, 32>}, {transform_indices = @transform_1, window_bounds = array<i64: 32, 256>}, {transform_indices = @transform_2, window_bounds = array<i64: 64, 256>}]} {
    %c0 = arith.constant 0 : index
    %c0_0 = arith.constant 0 : index
    %0 = vector.load %arg2[%c0, %c0_0] : memref<64x32xf32, #tpu.memory_space<vmem>>, vector<64x32xf32>
    %c0_1 = arith.constant 0 : index
    %c0_2 = arith.constant 0 : index
    %1 = vector.load %arg3[%c0_1, %c0_2] : memref<32x256xf32, #tpu.memory_space<vmem>>, vector<32x256xf32>
    %cst = arith.constant dense<0.000000e+00> : vector<64x256xf32>
    %2 = tpu.matmul %0, %1, %cst {dimension_numbers = #tpu.dot_dimension_numbers<[1], [0], [0], [1], [0, 0, 1, 1], [], []>} : vector<64x32xf32>, vector<32x256xf32>, vector<64x256xf32> -> vector<64x256xf32>
    %c0_3 = arith.constant 0 : index
    %c0_4 = arith.constant 0 : index
    %3 = vector.load %arg4[%c0_3, %c0_4] : memref<64x256xf32, #tpu.memory_space<vmem>>, vector<64x256xf32>
    tpu.vector_store %arg4[%c0_3, %c0_4], %2 {strides = array<i32>} : memref<64x256xf32, #tpu.memory_space<vmem>>, vector<64x256xf32>,
    return
  }
  func.func @transform_0(%arg0: i32, %arg1: i32) -> (i32, i32) {
    %c0_i32 = arith.constant 0 : i32
    %c0_i32_0 = arith.constant 0 : i32
    return %arg1, %c0_i32 : i32, i32
  }
  func.func @transform_1(%arg0: i32, %arg1: i32) -> (i32, i32) {
    %c0_i32 = arith.constant 0 : i32
    %c0_i32_0 = arith.constant 0 : i32
    return %c0_i32, %arg0 : i32, i32
  }
  func.func @transform_2(%arg0: i32, %arg1: i32) -> (i32, i32) {
    %c0_i32 = arith.constant 0 : i32
    return %arg1, %arg0 : i32, i32
  }
}

</mosaic_0001>

<bundles_post_ra>
// kernel: _matmul_abt.1
= control target key start
LH: loop header
LB: loop body
LE: loop exit
PB: predicated region body
PF: predicated region fallthrough
CT: control target
= control target key end

     0   :  { %7 = vsyncpa [#allocation3], 0  ;;  %s820_s0 = inlined_call_operand.vmem [shape: f32[128,32], index: 0, kind: input, shape index: {}]   ;;  %s821_s1 = inlined_call_operand.vmem [shape: f32[32,256], index: 1, kind: input, shape index: {}]   ;;  %s822_s2 = inlined_call_operand.hbm [shape: f32[128,256], index: 2, kind: output, shape index: {}]  }
   0x1   :  { %9 = vsyncpa [#allocation3 + $0x1], 0  ;;  %s651_s9 = smov 0   ;;  %s653_s10 = smov 0  }
   0x2   :  { %s655_s11 = smov 0   ;;  %s657_s12 = smov 0  }
   0x3   :  { %s659_s13 = smov 0   ;;  %s661_s14 = smov 0  }
   0x4 LB: > { %s457_s15 = sadd.s32 4294967295, %s630_s14   ;;  %s458_s16 = sadd.s32 4294967294, %s630_s14   ;;  %s630_s14 = sphi %s661_s14, %s15_s14   ;;  %s626_s13 = sphi %s659_s13, %s829_s13   ;;  %s622_s12 = sphi %s657_s12, %s828_s12   ;;  %s618_s11 = sphi %s655_s11, %s827_s11   ;;  %s614_s10 = sphi %s653_s10, %s826_s10   ;;  %s610_s9 = sphi %s651_s9, %s825_s9  }
   0x5   : > { %s24_s17 = sadd.s32 1, %s626_s13  ;;  %s88_s18 = sadd.s32 1, %s618_s11 }
   0x6   : > { %p25_p0 = scmp.ge.s32.totalorder %s24_s17, 2  ;;  %p98_p1 = scmp.ne.s32.totalorder %s618_s11, %s614_s10 }
   0x7   : > { %p99_p2 = scmp.eq.s32.totalorder %s457_s15, 1  ;;  %p104_p3 = scmp.ne.s32.totalorder %s614_s10, %s610_s9 }
   0x8   : > { %s831_s17 = smov (%p25_p0, %s24_s17), 0  ;;  %p105_p5 = scmp.eq.s32.totalorder %s458_s16, 1 }
   0x9   : > { %p691_p4 = por %p99_p2, %p98_p1  ;;  %s83_s20 = ssub.s32 %s626_s13, %s831_s17 }
   0xa   : > { %p462_p6 = scmp.ge.s32.totalorder %s630_s14, 1  ;;  %p86_p7 = scmp.eq.s32.totalorder %s83_s20, 0 }
   0xb   : > { %p698_p8 = por %p105_p5, %p104_p3  ;;  %p141_p9 = scmp.lt.s32.totalorder %s630_s14, 3 }
   0xc   : > { %s704_s22 = scalar_select %p86_p7, %s618_s11, %s88_s18  }
   0xd   : > { %p142_p10 = pnand %p462_p6, %p141_p9 }
   0xe   : > { %v191_v0 = vld [vmem:[%s821_s1 + $0x8] sm:$0xff] (!%p142_p10)  ;;  %v193_v1 = vld [vmem:[%s821_s1 + $0x18] sm:$0xff] (!%p142_p10)  ;;  %v190_v2 = vld [vmem:[%s821_s1] sm:$0xff] (!%p142_p10)  ;;  %s464_s29 = sshll.u32 (!%p142_p10), %s622_s12, 3  ;;  %v632_v7 = vmov (!%p142_p10), 0.0   ;;  %vm198_vm0 = vcmask (!%p142_p10), 261120  }
   0xf   : > { %145 = sbr.rel (%p142_p10) target bundleno = 267 (0x10b), region = 28  ;;  %v482_v3 = vpack.c.bf16 (!%p142_p10), %v193_v1, %v191_v0  ;;  %v192_v4 = vld [vmem:[%s821_s1 + $0x10] sm:$0xff] (!%p142_p10)  ;;  %v195_v5 = vld [vmem:[%s821_s1 + $0x28] sm:$0xff] (!%p142_p10)  ;;  %v197_v6 = vld [vmem:[%s821_s1 + $0x38] sm:$0xff] (!%p142_p10)  ;;  %287 = vmatprep.mubr.f32.mxu0 (!%p142_p10), %v632_v7  ;;  %311 = vmatprep.mubr.f32.mxu1 (!%p142_p10), %v632_v7  ;;  %p169_p11 = scmp.lt.s32.totalorder (!%p142_p10), %s464_s29, 15 }
  0x10   : > { %v484_v8 = vpack.c.bf16 (!%p142_p10), %v192_v4, %v190_v2  ;;  %v486_v9 = vpack.c.bf16 (!%p142_p10), %v197_v6, %v195_v5  ;;  %v194_v10 = vld [vmem:[%s821_s1 + $0x20] sm:$0xff] (!%p142_p10)  ;;  %v196_v11 = vld [vmem:[%s821_s1 + $0x30] sm:$0xff] (!%p142_p10)  ;;  %s165_s26 = sand.u32 (!%p142_p10), 1, %s614_s10   ;;  %s633_s7 = smov (!%p142_p10), [#allocation2]  }
  0x11   : > { %483 = vmatprep.subr.bf16.mxu0 (!%p142_p10), %v482_v3  ;;  %490 = vmatprep.subr.bf16.mxu1 (!%p142_p10), %v482_v3  ;;  %v488_v12 = vpack.c.bf16 (!%p142_p10), %v196_v11, %v194_v10  ;;  %s463_s27 = sshll.u32 (!%p142_p10), %s165_s26, 7  ;;  %s556_s8 = sshll.u32 (!%p142_p10), %s633_s7, 4  ;;  %s557_s8 = int_to_ptr.vmem [resolvable:$false] %s556_s8 }
  0x12   : > { %485 = vmatpush1.bf16.msra.mxu0 (!%p142_p10), %v484_v8  ;;  %492 = vmatpush1.bf16.msra.mxu1 (!%p142_p10), %v484_v8  ;;  %s745_s28 = scalar_lea.vmem (!%p142_p10), [#allocation2], %s463_s27  ;;  %s558_s15 = scalar_lea.vmem (!%p142_p10), %s557_s8, 4096 }
  0x13   : > { %487 = vmatprep.subr.bf16.mxu0 (!%p142_p10), %v486_v9  ;;  %491 = vmatprep.subr.bf16.mxu1 (!%p142_p10), %v486_v9  ;;  %s369_s30 = sshll.u32 (!%p142_p10), %s745_s28, 4  ;;  %s766_s30 = int_to_ptr.vmem [resolvable:$true] %s369_s30 }
  0x14   : > { %s552_s6 = scalar_lea.vmem (!%p142_p10), %s766_s30, 2048  ;;  %p559_p1 = scmp.lt.s32.totalorder (!%p142_p10), %s766_s30, %s557_s8 }
  0x15   : > { %p553_p12 = scmp.ne.s32.totalorder (!%p142_p10), %s766_s30, %s552_s6  ;;  %p560_p2 = scmp.lt.s32.totalorder (!%p142_p10), %s558_s15, %s552_s6 }
  0x16   : > { %s833_s29 = smov (!%p169_p11, %s464_s29), 15  ;;  %489 = vmatpush1.bf16.msra.mxu0 %v488_v12  ;;  %493 = vmatpush1.bf16.msra.mxu1 %v488_v12 }
  0x17   : > { %s465_s20 = sshll.u32 %s833_s29, 3  ;;  %s481_s29 = sshll.u32 %s622_s12, 11 }
  0x18   : > { %s172_s25 = scalar_lea.vmem %s820_s0, %s465_s20  ;;  %s764_s5 = scalar_lea.hbm %s822_s2, %s481_s29 }
  0x19   : > { %v182_v13 = vld [vmem:[%s172_s25] sm:$0xff]  ;;  %v183_v15 = vld [vmem:[%s172_s25 + $0x8] sm:$0xff]  ;;  %v184_v17 = vld [vmem:[%s172_s25 + $0x10] sm:$0xff]  ;;  %s774_s12 = scalar_lea.sflag [#allocation3], %s165_s26  ;;  %p554_p13 = pnand %p553_p12, %p691_p4 }
  0x1a   : > { %v186_v14 = vld [vmem:[%s172_s25 + $0x20] sm:$0xff]  ;;  %466 = vmatmul.mubr.msk.f32.vlgmr.msra.gmra.mrb[0].mxu0 %vm198_vm0, %v182_v13  ;;  %v187_v16 = vld [vmem:[%s172_s25 + $0x28] sm:$0xff]  ;;  %v188_v18 = vld [vmem:[%s172_s25 + $0x30] sm:$0xff]  ;;  %p561_p3 = por %p560_p2, %p559_p1 }
  0x1b   : > { %470 = vmatmul.mubr.msk.f32.vlgmr.msra.gmra.mrb[0].mxu1 %vm198_vm0, %v186_v14  ;;  %293 = vmatprep.mubr.f32.mxu0 %v632_v7  ;;  %v185_v19 = vld [vmem:[%s172_s25 + $0x18] sm:$0xff]  ;;  %p555_p0 = pneg %p554_p13 }
  0x1c   : > { %317 = vmatprep.mubr.f32.mxu1 %v632_v7  ;;  %v189_v20 = vld [vmem:[%s172_s25 + $0x38] sm:$0xff] }
  0x1d   : > { %p562_p5 = pnand %p561_p3, %p555_p0 }
  0x1e   : > { %467 = vmatmul.mubr.msk.f32.gmra.mrb[2].mxu0 %vm198_vm0, %v183_v15 }
  0x1f   : > { %471 = vmatmul.mubr.msk.f32.gmra.mrb[2].mxu1 %vm198_vm0, %v187_v16  ;;  %299 = vmatprep.mubr.f32.mxu0 %v632_v7 }
  0x20   : > { %323 = vmatprep.mubr.f32.mxu1 %v632_v7 }
  0x22   : > { %468 = vmatmul.mubr.msk.f32.gmra.mrb[4].mxu0 %vm198_vm0, %v184_v17 }
  0x23   : > { %472 = vmatmul.mubr.msk.f32.gmra.mrb[4].mxu1 %vm198_vm0, %v188_v18  ;;  %305 = vmatprep.mubr.f32.mxu0 %v632_v7 }
  0x24   : > { %329 = vmatprep.mubr.f32.mxu1 %v632_v7 }
  0x26   : > { %469 = vmatmul.mubr.msk.f32.gmra.mrb[6].mxu0 %vm198_vm0, %v185_v19 }
  0x27   : > { %473 = vmatmul.mubr.msk.f32.gmra.mrb[6].mxu1 %vm198_vm0, %v189_v20 }
  0xed   : > { %v289_v21 = vpop.f32.mrb[0].mxu0 }
  0xee   : > { %v313_v22 = vpop.f32.mrb[0].mxu1  ;;  %336 = vst [vmem:[%s745_s28] sm:$0xff] %v289_v21  ;;  %v291_v23 = vpop.f32.mrb[1].mxu0 }
  0xef   : > { %344 = vst [vmem:[%s745_s28 + $0x40] sm:$0xff] %v313_v22  ;;  %v315_v24 = vpop.f32.mrb[1].mxu1  ;;  %337 = vst [vmem:[%s745_s28 + $0x8] sm:$0xff] %v291_v23 }
  0xf0   : > { %345 = vst [vmem:[%s745_s28 + $0x48] sm:$0xff] %v315_v24 }
  0xf1   : > { %v295_v25 = vpop.f32.mrb[2].mxu0 }
  0xf2   : > { %v319_v26 = vpop.f32.mrb[2].mxu1  ;;  %338 = vst [vmem:[%s745_s28 + $0x10] sm:$0xff] %v295_v25  ;;  %v297_v27 = vpop.f32.mrb[3].mxu0 }
  0xf3   : > { %346 = vst [vmem:[%s745_s28 + $0x50] sm:$0xff] %v319_v26  ;;  %v321_v28 = vpop.f32.mrb[3].mxu1  ;;  %339 = vst [vmem:[%s745_s28 + $0x18] sm:$0xff] %v297_v27 }
  0xf4   : > { %347 = vst [vmem:[%s745_s28 + $0x58] sm:$0xff] %v321_v28 }
  0xf5   : > { %v301_v29 = vpop.f32.mrb[4].mxu0 }
  0xf6   : > { %v325_v30 = vpop.f32.mrb[4].mxu1  ;;  %340 = vst [vmem:[%s745_s28 + $0x20] sm:$0xff] %v301_v29  ;;  %v303_v31 = vpop.f32.mrb[5].mxu0 }
  0xf7   : > { %348 = vst [vmem:[%s745_s28 + $0x60] sm:$0xff] %v325_v30  ;;  %v327_v32 = vpop.f32.mrb[5].mxu1  ;;  %341 = vst [vmem:[%s745_s28 + $0x28] sm:$0xff] %v303_v31 }
  0xf8   : > { %349 = vst [vmem:[%s745_s28 + $0x68] sm:$0xff] %v327_v32 }
  0xf9   : > { %v307_v33 = vpop.f32.mrb[6].mxu0 }
  0xfa   : > { %v331_v34 = vpop.f32.mrb[6].mxu1  ;;  %342 = vst [vmem:[%s745_s28 + $0x30] sm:$0xff] %v307_v33  ;;  %v309_v35 = vpop.f32.mrb[7].mxu0 }
  0xfb   : > { %350 = vst [vmem:[%s745_s28 + $0x70] sm:$0xff] %v331_v34  ;;  %v333_v36 = vpop.f32.mrb[7].mxu1  ;;  %343 = vst [vmem:[%s745_s28 + $0x38] sm:$0xff] %v309_v35 }
  0xfc   : > { %351 = vst [vmem:[%s745_s28 + $0x78] sm:$0xff] %v333_v36 }
  0xfd   : > { %565 = shalt.err (!%p562_p5)
}
  0xfe   : > { %s566_s16 = scalar_lea.hbm %s764_s5, 2048  ;;  %s570_s23 = scalar_lea.hbm %s822_s2, 4096 }
  0xff   : > { %p567_p6 = scmp.ne.s32.totalorder %s764_s5, %s566_s16  ;;  %p571_p10 = scmp.lt.u32.totalorder %s764_s5, %s822_s2 }
 0x100   : > { %p572_p11 = scmp.lt.u32.totalorder %s570_s23, %s566_s16  ;;  %p574_p13 = scmp.lt.u32.totalorder %s566_s16, %s764_s5 }
 0x101   : > { %p568_p7 = pnand %p567_p6, %p691_p4 }
 0x102   : > { %p573_p12 = por %p572_p11, %p571_p10 }
 0x103   : > { %p569_p9 = pneg %p568_p7 }
 0x104   : > { %p575_p0 = por %p574_p13, %p573_p12 }
 0x106   : > { %p576_p1 = pnand %p575_p0, %p569_p9 }
 0x108   : > { %579 = shalt.err (!%p576_p1)
}
 0x109   : > { %s634_s26 = smov 256   ;;  %s635_s27 = smov 16  }
 0x10a   : > { %494 = dma.vmem_to_hbm [thread:$0]  (%p691_p4), %s766_s30, 2048, %s764_s5, %s774_s12, %s634_s26, %s634_s26, %s635_s27  }
 0x10b PF: > { %p500_p2 = scmp.ge.s32.totalorder %s630_s14, 2  ;;  %s384_s28 = sand.u32 1, %s610_s9  }
 0x10c   : > { %s385_s29 = scalar_lea.sflag [#allocation3], %s384_s28 }
 0x10d   : > { %p497_p3 = pnand %p500_p2, %p698_p8 }
 0x10f   : > { %605 = dma.done.wait (!%p497_p3), %s385_s29, 2048  }
 0x110   : > { %607 = vsyncadd (!%p497_p3), %s385_s29, 4294965248  ;;  %s15_s14 = sadd.s32 1, %s630_s14   ;;  %s825_s9 = smov %s614_s10 }
 0x111   : > { %p12_p5 = scmp.ge.s32.totalorder %s15_s14, 4   ;;  %s826_s10 = smov %s618_s11 }
 0x112   : > { %s827_s11 = smov %s704_s22  ;;  %s828_s12 = smov %s626_s13 }
 0x113   : > { %s829_s13 = smov %s831_s17  ;;  %14 = sbr.rel (!%p12_p5) target bundleno = 4 (0x4), region = 66 }
 0x11a   :  { %390 = vsyncpa [#allocation3], 1 }
 0x11b   :  { %392 = vsyncpa [#allocation3 + $0x1], 1 }

</bundles_post_ra>
